<compile_context>
chip_gen: v5e
topology: v5e:2x2
jax: 0.10.0
libtpu: 0.0.40
codegen_flags: <defaults>
</compile_context>

<pallas_src>
import functools

import jax
import jax.numpy as jnp
from jax.experimental import pallas as pl
from jax.experimental.pallas import tpu as pltpu

LANE = 128
SUBLANE = 8  # f32 accumulator sublane count


def _vmem_capacity_bytes() -> int:
    try:
        return int(pltpu.get_tpu_info().vmem_capacity_bytes)
    except Exception:
        return 64 * 1024 * 1024  # conservative (v7x-sized) fallback


def _num_tensorcores() -> int:
    # Only v7x has 2 TensorCores per chip; v5e/v6e are single-TC.
    try:
        kind = jax.devices()[0].device_kind.lower()
        if "v7" in kind or "7x" in kind:
            return 2
    except Exception:
        pass
    return 1


def _simse_partial_kernel(pred_ref, real_ref, o_ref, *, rows_valid):
    c = pl.program_id(0)                 # TensorCore slot (size 1 except v7x)
    i = pl.program_id(1)                 # row-tile index within this slot
    tiles_per_slot = pl.num_programs(1)
    tile_rows = pred_ref.shape[0]

    @pl.when(i == 0)
    def _init():
        o_ref[...] = jnp.zeros_like(o_ref)

    # Hot path: widen-to-f32 diff (VPU) + fold into the (8,128) accumulator.
    diff = real_ref[...].astype(jnp.float32) - pred_ref[...].astype(jnp.float32)
    row_start = (c * tiles_per_slot + i) * tile_rows

    def _fold(d):
        o_ref[0] += jnp.sum(d.reshape(tile_rows // SUBLANE, SUBLANE, LANE), axis=0)

    needs_mask = row_start + tile_rows > rows_valid

    @pl.when(jnp.logical_not(needs_mask))
    def _fast():
        # Interior tiles: no masking ops at all (pure cast/sub/reduce).
        _fold(diff)

    @pl.when(needs_mask)
    def _tail():
        # Edge / phantom tiles: zero rows past the end of the real array.
        row_idx = jax.lax.broadcasted_iota(jnp.int32, (tile_rows, LANE), 0) + row_start
        _fold(jnp.where(row_idx < rows_valid, diff, 0.0))


def simse(pred: jax.Array, real: jax.Array, *, max_tile_rows: int | None = None) -> jax.Array:
    """Returns a scalar float32 = (sum(real - pred))^2 / numel^2."""
    assert pred.shape == real.shape, (pred.shape, real.shape)
    n_elems = pred.size
    if n_elems == 0:
        return jnp.float32(0.0)

    p = pred.reshape(-1)
    r = real.reshape(-1)
    rem = n_elems % LANE
    if rem:
        # TODO(synk): rare path (numel % 128 != 0) still materializes a padded
        # copy of both inputs; a 1-D BlockSpec + flat-index mask would avoid it.
        pad = LANE - rem
        p = jnp.pad(p, (0, pad))
        r = jnp.pad(r, (0, pad))
    rows = p.size // LANE
    p2 = p.reshape(rows, LANE)            # metadata-only when rem == 0
    r2 = r.reshape(rows, LANE)

    itemsize = jnp.dtype(pred.dtype).itemsize
    packing = max(SUBLANE, 32 // max(itemsize, 1))   # 8 f32, 16 bf16, 32 int8/fp8

    # Tile sizing: ~VMEM/4 for the double-buffered input pipeline
    # (2 inputs x 2 buffers), capped at 32 MiB; respects v7x's 64 MiB VMEM/TC.
    cap = _vmem_capacity_bytes()
    pipeline_budget = min(cap // 4, 32 * 1024 * 1024)
    per_block_bytes = pipeline_budget // 4
    hw_tile_rows = max(packing, (per_block_bytes // (LANE * itemsize)) // packing * packing)
    if max_tile_rows is not None:
        hw_tile_rows = min(hw_tile_rows, max(packing, (max_tile_rows // packing) * packing))

    rows_up = -(-rows // packing) * packing           # round rows up to packing
    tile_rows = min(hw_tile_rows, rows_up)

    total_tiles = -(-rows // tile_rows)               # ceil
    num_slots = _num_tensorcores() if total_tiles > 1 else 1
    tiles_per_slot = -(-total_tiles // num_slots)     # ceil
    grid = (num_slots, tiles_per_slot)

    def in_map(c, i):
        t = c * tiles_per_slot + i
        # Clamp phantom tiles (past the end) onto the last real block; their
        # contribution is zeroed by the in-kernel row mask.
        return (jnp.minimum(t, total_tiles - 1), 0)

    if num_slots > 1:
        dims = (getattr(pltpu, "CORE_PARALLEL", "parallel"),
                getattr(pltpu, "ARBITRARY", "arbitrary"))
    else:
        dims = ("arbitrary", "arbitrary")

    block_in = tile_rows * LANE * itemsize
    block_f32 = tile_rows * LANE * 4
    vmem_limit = 4 * block_in + 2 * block_f32 + (4 << 20)      # pipeline + temps + headroom
    vmem_limit = max(32 << 20, min(vmem_limit, max(32 << 20, cap - (8 << 20))))

    kernel = functools.partial(_simse_partial_kernel, rows_valid=rows)
    partials = pl.pallas_call(
        kernel,
        out_shape=jax.ShapeDtypeStruct((num_slots, SUBLANE, LANE), jnp.float32),
        grid_spec=pltpu.PrefetchScalarGridSpec(
            num_scalar_prefetch=0,
            grid=grid,
            in_specs=[
                pl.BlockSpec((tile_rows, LANE), in_map),
                pl.BlockSpec((tile_rows, LANE), in_map),
            ],
            out_specs=pl.BlockSpec((1, SUBLANE, LANE), lambda c, i: (c, 0, 0)),
        ),
        compiler_params=pltpu.CompilerParams(
            dimension_semantics=dims,
            vmem_limit_bytes=int(vmem_limit),
        ),
    )(p2, r2)

    # Tiny final reduce (num_slots*8*128 elems) + scale + square in plain XLA.
    s = jnp.sum(partials)
    mean = s * jnp.float32(1.0 / float(n_elems))     # f64 constant -> f32
    return mean * mean                               # (sum/n)^2 == sum^2/n^2


if __name__ == "__main__":
    key = jax.random.PRNGKey(0)
    k1, k2, k3, k4 = jax.random.split(key, 4)

    # Case 1: typical NCHW-shaped tensors, as at a PyTorch call site.
    pred = jax.random.normal(k1, (2, 4, 16, 16), dtype=jnp.float32)
    real = jax.random.normal(k2, (2, 4, 16, 16), dtype=jnp.float32)
    out = jax.block_until_ready(simse(pred, real))
    d = real - pred
    ref = (jnp.sum(d) / d.size) ** 2
    assert jnp.allclose(out, ref, rtol=1e-5, atol=1e-6), (out, ref)

    # Case 2: multi-tile streaming + tail-masked edge tile (tiny tile override
    # just to exercise the accumulation / mask paths at small sizes).
    pred2 = jax.random.normal(k3, (5, 16, 32), dtype=jnp.float32)
    real2 = jax.random.normal(k4, (5, 16, 32), dtype=jnp.float32)
    out2 = jax.block_until_ready(simse(pred2, real2, max_tile_rows=8))
    d2 = real2 - pred2
    ref2 = (jnp.sum(d2) / d2.size) ** 2
    assert jnp.allclose(out2, ref2, rtol=1e-5, atol=1e-6), (out2, ref2)

    print("KERNEL_OK")
</pallas_src>

<mosaic_0001>
module attributes {stable_mosaic.version = 11 : i64} {
  func.func @_simse_partial_kernel(%arg0: i32, %arg1: i32, %arg2: memref<16x128xf32, #tpu.memory_space<vmem>>, %arg3: memref<16x128xf32, #tpu.memory_space<vmem>>, %arg4: memref<1x8x128xf32, #tpu.memory_space<vmem>>) attributes {dimension_semantics = [#tpu.dimension_semantics<arbitrary>, #tpu.dimension_semantics<arbitrary>], iteration_bounds = array<i64: 1, 1>, scalar_prefetch = 0 : i64, scratch_operands = 0 : i64, tpu.core_type = #tpu.core_type<tc>, window_params = [{transform_indices = @transform_0, window_bounds = array<i64: 16, 128>}, {transform_indices = @transform_1, window_bounds = array<i64: 16, 128>}, {transform_indices = @transform_2, window_bounds = array<i64: 1, 8, 128>}]} {
    %c0_i32 = arith.constant 0 : i32
    %0 = arith.cmpi eq, %arg1, %c0_i32 : i32
    %1 = arith.extui %0 : i1 to i32
    %c0_i32_0 = arith.constant 0 : i32
    %2 = arith.cmpi ne, %1, %c0_i32_0 : i32
    scf.if %2 {
      %cst = arith.constant 0.000000e+00 : f32
      %16 = vector.broadcast %cst : f32 to vector<1x8x128xf32>
      %c0_8 = arith.constant 0 : index
      %c0_9 = arith.constant 0 : index
      %c0_10 = arith.constant 0 : index
      %17 = vector.load %arg4[%c0_8, %c0_9, %c0_10] : memref<1x8x128xf32, #tpu.memory_space<vmem>>, vector<1x8x128xf32>
      tpu.vector_store %arg4[%c0_8, %c0_9, %c0_10], %16 {strides = array<i32>} : memref<1x8x128xf32, #tpu.memory_space<vmem>>, vector<1x8x128xf32>,
    } else {
    }
    %c0 = arith.constant 0 : index
    %c0_1 = arith.constant 0 : index
    %3 = vector.load %arg3[%c0, %c0_1] : memref<16x128xf32, #tpu.memory_space<vmem>>, vector<16x128xf32>
    %c0_2 = arith.constant 0 : index
    %c0_3 = arith.constant 0 : index
    %4 = vector.load %arg2[%c0_2, %c0_3] : memref<16x128xf32, #tpu.memory_space<vmem>>, vector<16x128xf32>
    %5 = arith.subf %3, %4 : vector<16x128xf32>
    %c1_i32 = arith.constant 1 : i32
    %6 = arith.muli %arg0, %c1_i32 : i32
    %7 = arith.addi %6, %arg1 : i32
    %c16_i32 = arith.constant 16 : i32
    %8 = arith.muli %7, %c16_i32 : i32
    %c16_i32_4 = arith.constant 16 : i32
    %9 = arith.addi %8, %c16_i32_4 : i32
    %c16_i32_5 = arith.constant 16 : i32
    %10 = arith.cmpi sgt, %9, %c16_i32_5 : i32
    %true = arith.constant true
    %11 = arith.xori %10, %true : i1
    %12 = arith.extui %11 : i1 to i32
    %c0_i32_6 = arith.constant 0 : i32
    %13 = arith.cmpi ne, %12, %c0_i32_6 : i32
    scf.if %13 {
      %c0_8 = arith.constant 0 : index
      %c0_9 = arith.constant 0 : index
      %c0_10 = arith.constant 0 : index
      %16 = vector.load %arg4[%c0_8, %c0_9, %c0_10] : memref<1x8x128xf32, #tpu.memory_space<vmem>>, vector<1x8x128xf32>
      %17 = vector.shape_cast %16 : vector<1x8x128xf32> to vector<8x128xf32>
      %18 = vector.shape_cast %5 : vector<16x128xf32> to vector<2x8x128xf32>
      %cst = arith.constant dense<0.000000e+00> : vector<8x128xf32>
      %19 = vector.multi_reduction <add>, %18, %cst [0] : vector<2x8x128xf32> to vector<8x128xf32>
      %20 = arith.addf %17, %19 : vector<8x128xf32>
      %c0_11 = arith.constant 0 : index
      %c0_12 = arith.constant 0 : index
      %c0_13 = arith.constant 0 : index
      %21 = vector.load %arg4[%c0_11, %c0_12, %c0_13] : memref<1x8x128xf32, #tpu.memory_space<vmem>>, vector<1x8x128xf32>
      %22 = vector.shape_cast %21 : vector<1x8x128xf32> to vector<8x128xf32>
      %23 = vector.shape_cast %20 : vector<8x128xf32> to vector<1x8x128xf32>
      tpu.vector_store %arg4[%c0_11, %c0_12, %c0_13], %23 {strides = array<i32>} : memref<1x8x128xf32, #tpu.memory_space<vmem>>, vector<1x8x128xf32>,
    } else {
    }
    %14 = arith.extui %10 : i1 to i32
    %c0_i32_7 = arith.constant 0 : i32
    %15 = arith.cmpi ne, %14, %c0_i32_7 : i32
    scf.if %15 {
      %16 = tpu.iota {dimensions = array<i32: 0>} : vector<16x128xi32>
      %17 = vector.broadcast %8 : i32 to vector<16x128xi32>
      %18 = arith.addi %16, %17 : vector<16x128xi32>
      %c16_i32_8 = arith.constant 16 : i32
      %19 = vector.broadcast %c16_i32_8 : i32 to vector<16x128xi32>
      %20 = arith.cmpi slt, %18, %19 : vector<16x128xi32>
      %cst = arith.constant 0.000000e+00 : f32
      %21 = vector.broadcast %cst : f32 to vector<16x128xf32>
      %22 = arith.select %20, %5, %21 : vector<16x128xi1>, vector<16x128xf32>
      %c0_9 = arith.constant 0 : index
      %c0_10 = arith.constant 0 : index
      %c0_11 = arith.constant 0 : index
      %23 = vector.load %arg4[%c0_9, %c0_10, %c0_11] : memref<1x8x128xf32, #tpu.memory_space<vmem>>, vector<1x8x128xf32>
      %24 = vector.shape_cast %23 : vector<1x8x128xf32> to vector<8x128xf32>
      %25 = vector.shape_cast %22 : vector<16x128xf32> to vector<2x8x128xf32>
      %cst_12 = arith.constant dense<0.000000e+00> : vector<8x128xf32>
      %26 = vector.multi_reduction <add>, %25, %cst_12 [0] : vector<2x8x128xf32> to vector<8x128xf32>
      %27 = arith.addf %24, %26 : vector<8x128xf32>
      %c0_13 = arith.constant 0 : index
      %c0_14 = arith.constant 0 : index
      %c0_15 = arith.constant 0 : index
      %28 = vector.load %arg4[%c0_13, %c0_14, %c0_15] : memref<1x8x128xf32, #tpu.memory_space<vmem>>, vector<1x8x128xf32>
      %29 = vector.shape_cast %28 : vector<1x8x128xf32> to vector<8x128xf32>
      %30 = vector.shape_cast %27 : vector<8x128xf32> to vector<1x8x128xf32>
      tpu.vector_store %arg4[%c0_13, %c0_14, %c0_15], %30 {strides = array<i32>} : memref<1x8x128xf32, #tpu.memory_space<vmem>>, vector<1x8x128xf32>,
    } else {
    }
    return
  }
  func.func @transform_0(%arg0: i32, %arg1: i32) -> (i32, i32) {
    %c1_i32 = arith.constant 1 : i32
    %0 = arith.muli %arg0, %c1_i32 : i32
    %1 = arith.addi %0, %arg1 : i32
    %c0_i32 = arith.constant 0 : i32
    %2 = arith.minsi %1, %c0_i32 : i32
    %c0_i32_0 = arith.constant 0 : i32
    %c0_i32_1 = arith.constant 0 : i32
    return %2, %c0_i32_0 : i32, i32
  }
  func.func @transform_1(%arg0: i32, %arg1: i32) -> (i32, i32) {
    %c1_i32 = arith.constant 1 : i32
    %0 = arith.muli %arg0, %c1_i32 : i32
    %1 = arith.addi %0, %arg1 : i32
    %c0_i32 = arith.constant 0 : i32
    %2 = arith.minsi %1, %c0_i32 : i32
    %c0_i32_0 = arith.constant 0 : i32
    %c0_i32_1 = arith.constant 0 : i32
    return %2, %c0_i32_0 : i32, i32
  }
  func.func @transform_2(%arg0: i32, %arg1: i32) -> (i32, i32, i32) {
    %c0_i32 = arith.constant 0 : i32
    %c0_i32_0 = arith.constant 0 : i32
    %c0_i32_1 = arith.constant 0 : i32
    return %arg0, %c0_i32, %c0_i32_0 : i32, i32, i32
  }
}

</mosaic_0001>

<bundles_post_ra>
// kernel: tpu_custom_call.1
= control target key start
LH: loop header
LB: loop body
LE: loop exit
PB: predicated region body
PF: predicated region fallthrough
CT: control target
= control target key end

     0   :  { %7 = vsyncpa [#allocation3], 0  ;;  %s239_s0 = inlined_call_operand.hbm [shape: f32[16,128], index: 0, kind: input, shape index: {}]   ;;  %s240_s1 = inlined_call_operand.hbm [shape: f32[16,128], index: 1, kind: input, shape index: {}]   ;;  %s241_s2 = inlined_call_operand.hbm [shape: f32[1,8,128], index: 2, kind: output, shape index: {}]  }
   0x1   :  { %8 = vsyncpa [#allocation6], 0 }
   0x2   :  { %9 = vsyncpa [#allocation4], 0  ;;  %s20_s11 = sshll.u32 %s239_s0, 4  ;;  %s210_s12 = smov [#allocation2]   ;;  %s21_s11 = int_to_ptr.hbm [resolvable:$true] %s20_s11 }
   0x3   :  { %s22_s13 = sshll.u32 %s210_s12, 4  ;;  %s39_s16 = sshll.u32 %s240_s1, 4  ;;  %s23_s13 = int_to_ptr.vmem [resolvable:$true] %s22_s13  ;;  %s40_s16 = int_to_ptr.hbm [resolvable:$true] %s39_s16 }
   0x4   :  { %s211_s17 = smov 128   ;;  %s212_s18 = smov 8  }
   0x5   :  { %28 = dma.hbm_to_vmem [thread:$0]  %s21_s11, 256, %s23_s13, [#allocation3], %s211_s17, %s211_s17, %s212_s18  }
   0x6   :  { %s213_s19 = smov [#allocation5]  }
   0x7   :  { %s41_s20 = sshll.u32 %s213_s19, 4  ;;  %s42_s20 = int_to_ptr.vmem [resolvable:$true] %s41_s20 }
   0x8   :  { %47 = dma.hbm_to_vmem [thread:$0]  %s40_s16, 256, %s42_s20, [#allocation6], %s211_s17, %s211_s17, %s212_s18  }
   0x9   :  { %204 = dma.done.wait [#allocation3], 256  }
   0xa   :  { %205 = vsyncadd [#allocation3], 4294967040 }
   0xb   :  { %206 = dma.done.wait [#allocation6], 256  }
   0xc   :  { %207 = vsyncadd [#allocation6], 4294967040  ;;  %v69_v0 = vld [vmem:[#allocation5] sm:$0xff]  ;;  %v70_v1 = vld [vmem:[#allocation5 + $0x8] sm:$0xff]  ;;  %s214_s0 = smov [#allocation7]   ;;  %s111_s23 = sshll.u32 %s241_s2, 4  ;;  %s112_s23 = int_to_ptr.hbm [resolvable:$true] %s111_s23 }
   0xd   :  { %v71_v2 = vld [vmem:[#allocation2] sm:$0xff]  ;;  %v72_v3 = vld [vmem:[#allocation2 + $0x8] sm:$0xff]  ;;  %s109_s1 = sshll.u32 %s214_s0, 4  ;;  %s110_s1 = int_to_ptr.vmem [resolvable:$true] %s109_s1 }
   0xe   :  { %v73_v4 = vsub.f32 %v69_v0, %v71_v2  ;;  %v74_v5 = vsub.f32 %v70_v1, %v72_v3 }
  0x10   :  { %v84_v6 = vadd.f32 %v74_v5, %v73_v4 }
  0x12   :  { %86 = vst [vmem:[#allocation7] sm:$0xff] %v84_v6 }
  0x13   :  { %114 = dma.vmem_to_hbm [thread:$0]  %s110_s1, 128, %s112_s23, [#allocation4]  }
  0x14   :  { %208 = dma.done.wait [#allocation4], 128  }
  0x15   :  { %209 = vsyncadd [#allocation4], 4294967168 }
  0x16   :  { %119 = vsyncpa [#allocation3], 1 }
  0x17   :  { %120 = vsyncpa [#allocation6], 1 }
  0x18   :  { %121 = vsyncpa [#allocation4], 1 }

</bundles_post_ra>
